<compile_context>
chip_gen: v7x
topology: tpu7x:2x2x1
jax: 0.10.0
libtpu: 0.0.40
codegen_flags: <defaults>
</compile_context>

<pallas_src>
import functools
import math

import jax
import jax.numpy as jnp
import numpy as np
from jax.experimental import pallas as pl
from jax.experimental.pallas import tpu as pltpu


def _round_up(x, m):
    return ((x + m - 1) // m) * m


_NEG_INF = -1e30  # large finite mask value (avoids -inf -> NaN in online softmax)


# ---------------------------------------------------------------------------
# Pallas kernel: tiled matmul with bias folded into the accumulator init.
#   out = x @ w + b      x:(tm,tk) bf16, w:(tk,tn) bf16, b:(1,tn) f32
# ---------------------------------------------------------------------------
def _matmul_bias_kernel(x_ref, w_ref, b_ref, o_ref, acc_ref):
    k = pl.program_id(2)

    @pl.when(k == 0)
    def _():
        # bias-initialized accumulator: saves the epilogue add on the last k step
        acc_ref[...] = jnp.broadcast_to(b_ref[...], acc_ref.shape)

    acc_ref[...] += jnp.dot(x_ref[...], w_ref[...],
                            preferred_element_type=jnp.float32)

    @pl.when(k == pl.num_programs(2) - 1)
    def _():
        o_ref[...] = acc_ref[...].astype(o_ref.dtype)


def linear_pallas(x2d, w_t, b, *, out_dtype=jnp.float32):
    """out = x2d @ w_t + b.   x2d:(M,K), w_t:(K,N), b:(N,)."""
    M, K = x2d.shape
    K2, N = w_t.shape
    assert K == K2

    tm = min(512, _round_up(M, 8))
    tn = min(512, _round_up(N, 128))
    tk = min(1024, _round_up(K, 128))
    Mp, Np, Kp = _round_up(M, tm), _round_up(N, tn), _round_up(K, tk)

    xp = x2d.astype(jnp.bfloat16)
    if (Mp, Kp) != (M, K):
        xp = jnp.pad(xp, ((0, Mp - M), (0, Kp - K)))
    wp = w_t.astype(jnp.bfloat16)
    if (Kp, Np) != (K, N):
        wp = jnp.pad(wp, ((0, Kp - K), (0, Np - N)))
    bp = b.astype(jnp.float32)
    if Np != N:
        bp = jnp.pad(bp, ((0, Np - N),))
    bp = bp.reshape(1, Np)

    nk = Kp // tk
    out_itemsize = jnp.dtype(out_dtype).itemsize
    cost = pl.CostEstimate(
        flops=2 * Mp * Np * Kp,
        transcendentals=0,
        bytes_accessed=Mp * Kp * 2 + Kp * Np * 2 + Mp * Np * out_itemsize,
    )

    out = pl.pallas_call(
        _matmul_bias_kernel,
        out_shape=jax.ShapeDtypeStruct((Mp, Np), out_dtype),
        grid_spec=pltpu.PrefetchScalarGridSpec(
            num_scalar_prefetch=0,
            grid=(Mp // tm, Np // tn, nk),
            in_specs=[
                pl.BlockSpec((tm, tk), lambda i, j, k: (i, k)),
                pl.BlockSpec((tk, tn), lambda i, j, k: (k, j)),
                pl.BlockSpec((1, tn), lambda i, j, k: (0, j)),
            ],
            out_specs=pl.BlockSpec((tm, tn), lambda i, j, k: (i, j)),
            scratch_shapes=[pltpu.VMEM((tm, tn), jnp.float32)],
        ),
        compiler_params=pltpu.CompilerParams(
            dimension_semantics=("parallel", "parallel", "arbitrary")
        ),
        cost_estimate=cost,
    )(xp, wp, bp)

    if (Mp, Np) != (M, N):
        out = out[:M, :N]
    return out


# ---------------------------------------------------------------------------
# Pallas kernel: flash-style attention with the cross-conditional causal mask.
#   mask[i, j] = 1  iff  (j mod t) <= (i mod t),   t = T // 3
# ---------------------------------------------------------------------------
def _cca_attn_kernel(q_ref, k_ref, v_ref, o_ref, m_sc, l_sc, acc_sc,
                     *, t, seq_len, scale):
    kv = pl.program_id(2)

    @pl.when(kv == 0)
    def _():
        m_sc[...] = jnp.full_like(m_sc, _NEG_INF)
        l_sc[...] = jnp.zeros_like(l_sc)
        acc_sc[...] = jnp.zeros_like(acc_sc)

    q = q_ref[0]          # (tq, hd) bf16
    k = k_ref[0]          # (tk, hd) bf16
    tq, tk = q.shape[0], k.shape[0]

    s = jax.lax.dot_general(q, k, (((1,), (1,)), ((), ())),
                            preferred_element_type=jnp.float32) * scale  # (tq, tk)

    q0 = pl.program_id(1) * tq
    k0 = kv * tk
    qpos = q0 + jax.lax.broadcasted_iota(jnp.int32, (tq, tk), 0)
    kpos = k0 + jax.lax.broadcasted_iota(jnp.int32, (tq, tk), 1)

    # position-within-chunk, integer-exact (positions live in [0, 3t)): avoids
    # vector integer division — chunk index is just two compares.
    qchunk = (qpos >= t).astype(jnp.int32) + (qpos >= 2 * t).astype(jnp.int32)
    kchunk = (kpos >= t).astype(jnp.int32) + (kpos >= 2 * t).astype(jnp.int32)
    qmod = qpos - qchunk * t
    kmod = kpos - kchunk * t

    # padded query rows (>= seq_len) attend to all real keys so their softmax is
    # finite (they are sliced off by the wrapper); padded keys are always masked.
    allow = (kmod <= qmod) | (qpos >= seq_len)
    mask = (kpos < seq_len) & allow
    s = jnp.where(mask, s, _NEG_INF)

    m_prev = m_sc[...]
    m_new = jnp.maximum(m_prev, s.max(axis=-1, keepdims=True))
    alpha = jnp.exp(m_prev - m_new)
    p = jnp.exp(s - m_new)
    l_sc[...] = alpha * l_sc[...] + p.sum(axis=-1, keepdims=True)
    acc_sc[...] = alpha * acc_sc[...] + jax.lax.dot_general(
        p.astype(jnp.bfloat16), v_ref[0], (((1,), (0,)), ((), ())),
        preferred_element_type=jnp.float32)
    m_sc[...] = m_new

    @pl.when(kv == pl.num_programs(2) - 1)
    def _():
        o_ref[0] = (acc_sc[...] * pl.reciprocal(l_sc[...], approx=True)
                    ).astype(o_ref.dtype)


def _flash_cca_attention(q, k, v, *, t, seq_len, scale):
    """q, k, v: (BH, T_pad, hd) bf16 -> (BH, T_pad, hd) bf16."""
    BH, T_pad, hd = q.shape
    tile = min(256, T_pad)
    assert T_pad % tile == 0
    nq = T_pad // tile
    nkv = T_pad // tile

    kernel = functools.partial(_cca_attn_kernel, t=t, seq_len=seq_len, scale=scale)
    cost = pl.CostEstimate(
        flops=4 * BH * T_pad * T_pad * hd,
        transcendentals=BH * T_pad * T_pad,
        bytes_accessed=4 * BH * T_pad * hd * 2,
    )

    return pl.pallas_call(
        kernel,
        out_shape=jax.ShapeDtypeStruct((BH, T_pad, hd), jnp.bfloat16),
        grid_spec=pltpu.PrefetchScalarGridSpec(
            num_scalar_prefetch=0,
            grid=(BH, nq, nkv),
            in_specs=[
                pl.BlockSpec((1, tile, hd), lambda b, qi, ki: (b, qi, 0)),
                pl.BlockSpec((1, tile, hd), lambda b, qi, ki: (b, ki, 0)),
                pl.BlockSpec((1, tile, hd), lambda b, qi, ki: (b, ki, 0)),
            ],
            out_specs=pl.BlockSpec((1, tile, hd), lambda b, qi, ki: (b, qi, 0)),
            scratch_shapes=[
                pltpu.VMEM((tile, 1), jnp.float32),   # m
                pltpu.VMEM((tile, 1), jnp.float32),   # l
                pltpu.VMEM((tile, hd), jnp.float32),  # acc
            ],
        ),
        compiler_params=pltpu.CompilerParams(
            dimension_semantics=("parallel", "parallel", "arbitrary")
        ),
        cost_estimate=cost,
    )(q, k, v)


# ---------------------------------------------------------------------------
# Full module forward (Pallas path)
# ---------------------------------------------------------------------------
@functools.partial(jax.jit, static_argnums=(2,))
def cca_attention_pallas(x, params, n_head):
    B, T, C = x.shape
    assert C % n_head == 0
    assert T % 3 == 0, "CausalCrossConditionalSelfAttention requires T divisible by 3"
    hd = C // n_head
    t = T // 3
    scale = 1.0 / math.sqrt(hd)

    # ---- fused QKV projection: one pass over x ---------------------------
    w_qkv = jnp.concatenate(
        [params["wq"].T, params["wk"].T, params["wv"].T], axis=1)   # (C, 3C)
    b_qkv = jnp.concatenate([params["bq"], params["bk"], params["bv"]])
    qkv = linear_pallas(x.reshape(B * T, C), w_qkv, b_qkv,
                        out_dtype=jnp.bfloat16)                     # (B*T, 3C)

    # split heads: (3, B, nh, T, hd)
    qkv = qkv.reshape(B, T, 3, n_head, hd).transpose(2, 0, 3, 1, 4)
    BH = B * n_head
    q = qkv[0].reshape(BH, T, hd)
    k = qkv[1].reshape(BH, T, hd)
    v = qkv[2].reshape(BH, T, hd)

    # pad T to the flash tile if needed
    tile = min(256, _round_up(T, 8))
    T_pad = _round_up(T, tile)
    if T_pad != T:
        pad = ((0, 0), (0, T_pad - T), (0, 0))
        q, k, v = jnp.pad(q, pad), jnp.pad(k, pad), jnp.pad(v, pad)

    o = _flash_cca_attention(q, k, v, t=t, seq_len=T, scale=scale)

    # merge heads and apply the output projection (resid_drop = identity, eval)
    y = o[:, :T, :].reshape(B, n_head, T, hd).transpose(0, 2, 1, 3)
    y = y.reshape(B * T, C)
    out = linear_pallas(y, params["wp"].T, params["bp"], out_dtype=jnp.float32)
    return out.reshape(B, T, C)


# ---------------------------------------------------------------------------
# Pure-JAX reference (mirrors the PyTorch forward, eval mode)
# ---------------------------------------------------------------------------
def cca_attention_ref(x, params, n_head):
    B, T, C = x.shape
    hd = C // n_head
    t = T // 3

    def lin(z, w, b):
        return z @ w.T + b

    q = lin(x, params["wq"], params["bq"]).reshape(B, T, n_head, hd).transpose(0, 2, 1, 3)
    k = lin(x, params["wk"], params["bk"]).reshape(B, T, n_head, hd).transpose(0, 2, 1, 3)
    v = lin(x, params["wv"], params["bv"]).reshape(B, T, n_head, hd).transpose(0, 2, 1, 3)

    att = jnp.einsum("bhqd,bhkd->bhqk", q, k) * (1.0 / math.sqrt(hd))
    tril = jnp.tril(jnp.ones((t, t), jnp.float32))
    mask = jnp.tile(tril, (3, 3))                           # (T, T)
    att = jnp.where(mask[None, None, :, :] == 0, -jnp.inf, att)
    att = jax.nn.softmax(att, axis=-1)
    y = jnp.einsum("bhqk,bhkd->bhqd", att, v)
    y = y.transpose(0, 2, 1, 3).reshape(B, T, C)
    return lin(y, params["wp"], params["bp"])


# ---------------------------------------------------------------------------
# Deterministic parameter init (PyTorch nn.Linear-like uniform(+-1/sqrt(fan_in)))
# ---------------------------------------------------------------------------
def init_params(key, n_embd):
    ks = jax.random.split(key, 8)
    bound = 1.0 / math.sqrt(n_embd)

    def u(k, shape):
        return jax.random.uniform(k, shape, jnp.float32, -bound, bound)

    return dict(
        wq=u(ks[0], (n_embd, n_embd)), bq=u(ks[1], (n_embd,)),
        wk=u(ks[2], (n_embd, n_embd)), bk=u(ks[3], (n_embd,)),
        wv=u(ks[4], (n_embd, n_embd)), bv=u(ks[5], (n_embd,)),
        wp=u(ks[6], (n_embd, n_embd)), bp=u(ks[7], (n_embd,)),
    )


if __name__ == "__main__":
    key = jax.random.PRNGKey(0)
    kx, kp = jax.random.split(key)

    # small shapes consistent with the module: T divisible by 3 (3 conditional
    # chunks of length t = T//3), n_embd divisible by n_head.
    B, T, n_embd, n_head = 2, 24, 32, 4   # t = 8, head_dim = 8

    x = jax.random.normal(kx, (B, T, n_embd), jnp.float32)
    params = init_params(kp, n_embd)

    out = jax.block_until_ready(cca_attention_pallas(x, params, n_head))
    assert out.shape == (B, T, n_embd), out.shape

    ref = jax.block_until_ready(cca_attention_ref(x, params, n_head))
    np.testing.assert_allclose(np.asarray(out), np.asarray(ref),
                               atol=2e-2, rtol=2e-2)

    print("KERNEL_OK")
</pallas_src>

<mosaic_0001>
module attributes {stable_mosaic.version = 11 : i64} {
  func.func @_matmul_bias_kernel(%arg0: i32, %arg1: i32, %arg2: i32, %arg3: memref<48x128xbf16, #tpu.memory_space<vmem>>, %arg4: memref<128x128xbf16, #tpu.memory_space<vmem>>, %arg5: memref<1x128xf32, #tpu.memory_space<vmem>>, %arg6: memref<48x128xbf16, #tpu.memory_space<vmem>>, %arg7: memref<48x128xf32, #tpu.memory_space<vmem>>) attributes {dimension_semantics = [#tpu.dimension_semantics<parallel>, #tpu.dimension_semantics<parallel>, #tpu.dimension_semantics<arbitrary>], iteration_bounds = array<i64: 1, 1, 1>, scalar_prefetch = 0 : i64, scratch_operands = 1 : i64, tpu.core_type = #tpu.core_type<tc>, window_params = [{transform_indices = @transform_0, window_bounds = array<i64: 48, 128>}, {transform_indices = @transform_1, window_bounds = array<i64: 128, 128>}, {transform_indices = @transform_2, window_bounds = array<i64: 1, 128>}, {transform_indices = @transform_3, window_bounds = array<i64: 48, 128>}]} {
    %c0_i32 = arith.constant 0 : i32
    %0 = arith.cmpi eq, %arg2, %c0_i32 : i32
    %1 = arith.extui %0 : i1 to i32
    %c0_i32_0 = arith.constant 0 : i32
    %2 = arith.cmpi ne, %1, %c0_i32_0 : i32
    scf.if %2 {
      %c0_10 = arith.constant 0 : index
      %c0_11 = arith.constant 0 : index
      %12 = vector.load %arg5[%c0_10, %c0_11] : memref<1x128xf32, #tpu.memory_space<vmem>>, vector<1x128xf32>
      %13 = vector.shape_cast %12 : vector<1x128xf32> to vector<1x128xf32>
      %14 = vector.broadcast %13 : vector<1x128xf32> to vector<48x128xf32>
      %c0_12 = arith.constant 0 : index
      %c0_13 = arith.constant 0 : index
      %15 = vector.load %arg7[%c0_12, %c0_13] : memref<48x128xf32, #tpu.memory_space<vmem>>, vector<48x128xf32>
      tpu.vector_store %arg7[%c0_12, %c0_13], %14 {strides = array<i32>} : memref<48x128xf32, #tpu.memory_space<vmem>>, vector<48x128xf32>,
    } else {
    }
    %c0 = arith.constant 0 : index
    %c0_1 = arith.constant 0 : index
    %3 = vector.load %arg7[%c0, %c0_1] : memref<48x128xf32, #tpu.memory_space<vmem>>, vector<48x128xf32>
    %c0_2 = arith.constant 0 : index
    %c0_3 = arith.constant 0 : index
    %4 = vector.load %arg3[%c0_2, %c0_3] : memref<48x128xbf16, #tpu.memory_space<vmem>>, vector<48x128xbf16>
    %c0_4 = arith.constant 0 : index
    %c0_5 = arith.constant 0 : index
    %5 = vector.load %arg4[%c0_4, %c0_5] : memref<128x128xbf16, #tpu.memory_space<vmem>>, vector<128x128xbf16>
    %cst = arith.constant dense<0.000000e+00> : vector<48x128xf32>
    %6 = tpu.matmul %4, %5, %cst {dimension_numbers = #tpu.dot_dimension_numbers<[1], [0], [0], [1], [0, 0, 1, 1], [], []>} : vector<48x128xbf16>, vector<128x128xbf16>, vector<48x128xf32> -> vector<48x128xf32>
    %7 = arith.addf %3, %6 : vector<48x128xf32>
    %c0_6 = arith.constant 0 : index
    %c0_7 = arith.constant 0 : index
    %8 = vector.load %arg7[%c0_6, %c0_7] : memref<48x128xf32, #tpu.memory_space<vmem>>, vector<48x128xf32>
    tpu.vector_store %arg7[%c0_6, %c0_7], %7 {strides = array<i32>} : memref<48x128xf32, #tpu.memory_space<vmem>>, vector<48x128xf32>,
    %c0_i32_8 = arith.constant 0 : i32
    %9 = arith.cmpi eq, %arg2, %c0_i32_8 : i32
    %10 = arith.extui %9 : i1 to i32
    %c0_i32_9 = arith.constant 0 : i32
    %11 = arith.cmpi ne, %10, %c0_i32_9 : i32
    scf.if %11 {
      %c0_10 = arith.constant 0 : index
      %c0_11 = arith.constant 0 : index
      %12 = vector.load %arg7[%c0_10, %c0_11] : memref<48x128xf32, #tpu.memory_space<vmem>>, vector<48x128xf32>
      %13 = arith.truncf %12 : vector<48x128xf32> to vector<48x128xbf16>
      %c0_12 = arith.constant 0 : index
      %c0_13 = arith.constant 0 : index
      %14 = vector.load %arg6[%c0_12, %c0_13] : memref<48x128xbf16, #tpu.memory_space<vmem>>, vector<48x128xbf16>
      tpu.vector_store %arg6[%c0_12, %c0_13], %13 {strides = array<i32>} : memref<48x128xbf16, #tpu.memory_space<vmem>>, vector<48x128xbf16>,
    } else {
    }
    return
  }
  func.func @transform_0(%arg0: i32, %arg1: i32, %arg2: i32) -> (i32, i32) {
    %c0_i32 = arith.constant 0 : i32
    return %arg0, %arg2 : i32, i32
  }
  func.func @transform_1(%arg0: i32, %arg1: i32, %arg2: i32) -> (i32, i32) {
    %c0_i32 = arith.constant 0 : i32
    return %arg2, %arg1 : i32, i32
  }
  func.func @transform_2(%arg0: i32, %arg1: i32, %arg2: i32) -> (i32, i32) {
    %c0_i32 = arith.constant 0 : i32
    %c0_i32_0 = arith.constant 0 : i32
    return %c0_i32, %arg1 : i32, i32
  }
  func.func @transform_3(%arg0: i32, %arg1: i32, %arg2: i32) -> (i32, i32) {
    %c0_i32 = arith.constant 0 : i32
    return %arg0, %arg1 : i32, i32
  }
}

module attributes {stable_mosaic.version = 11 : i64} {
  func.func @_cca_attn_kernel(%arg0: i32, %arg1: i32, %arg2: i32, %arg3: memref<1x24x8xbf16, #tpu.memory_space<vmem>>, %arg4: memref<1x24x8xbf16, #tpu.memory_space<vmem>>, %arg5: memref<1x24x8xbf16, #tpu.memory_space<vmem>>, %arg6: memref<1x24x8xbf16, #tpu.memory_space<vmem>>, %arg7: memref<24x1xf32, #tpu.memory_space<vmem>>, %arg8: memref<24x1xf32, #tpu.memory_space<vmem>>, %arg9: memref<24x8xf32, #tpu.memory_space<vmem>>) attributes {dimension_semantics = [#tpu.dimension_semantics<parallel>, #tpu.dimension_semantics<parallel>, #tpu.dimension_semantics<arbitrary>], iteration_bounds = array<i64: 8, 1, 1>, scalar_prefetch = 0 : i64, scratch_operands = 3 : i64, tpu.core_type = #tpu.core_type<tc>, window_params = [{transform_indices = @transform_0, window_bounds = array<i64: 1, 24, 8>}, {transform_indices = @transform_1, window_bounds = array<i64: 1, 24, 8>}, {transform_indices = @transform_2, window_bounds = array<i64: 1, 24, 8>}, {transform_indices = @transform_3, window_bounds = array<i64: 1, 24, 8>}]} {
    %c0_i32 = arith.constant 0 : i32
    %0 = arith.cmpi eq, %arg2, %c0_i32 : i32
    %1 = arith.extui %0 : i1 to i32
    %c0_i32_0 = arith.constant 0 : i32
    %2 = arith.cmpi ne, %1, %c0_i32_0 : i32
    scf.if %2 {
      %cst_35 = arith.constant -1.000000e+30 : f32
      %75 = vector.broadcast %cst_35 : f32 to vector<24x1xf32>
      %c0_36 = arith.constant 0 : index
      %c0_37 = arith.constant 0 : index
      %76 = vector.load %arg7[%c0_36, %c0_37] : memref<24x1xf32, #tpu.memory_space<vmem>>, vector<24x1xf32>
      tpu.vector_store %arg7[%c0_36, %c0_37], %75 {strides = array<i32>} : memref<24x1xf32, #tpu.memory_space<vmem>>, vector<24x1xf32>,
      %cst_38 = arith.constant 0.000000e+00 : f32
      %77 = vector.broadcast %cst_38 : f32 to vector<24x1xf32>
      %c0_39 = arith.constant 0 : index
      %c0_40 = arith.constant 0 : index
      %78 = vector.load %arg8[%c0_39, %c0_40] : memref<24x1xf32, #tpu.memory_space<vmem>>, vector<24x1xf32>
      tpu.vector_store %arg8[%c0_39, %c0_40], %77 {strides = array<i32>} : memref<24x1xf32, #tpu.memory_space<vmem>>, vector<24x1xf32>,
      %cst_41 = arith.constant 0.000000e+00 : f32
      %79 = vector.broadcast %cst_41 : f32 to vector<24x8xf32>
      %c0_42 = arith.constant 0 : index
      %c0_43 = arith.constant 0 : index
      %80 = vector.load %arg9[%c0_42, %c0_43] : memref<24x8xf32, #tpu.memory_space<vmem>>, vector<24x8xf32>
      tpu.vector_store %arg9[%c0_42, %c0_43], %79 {strides = array<i32>} : memref<24x8xf32, #tpu.memory_space<vmem>>, vector<24x8xf32>,
    } else {
    }
    %c0 = arith.constant 0 : index
    %c0_1 = arith.constant 0 : index
    %c0_2 = arith.constant 0 : index
    %3 = vector.load %arg3[%c0, %c0_1, %c0_2] : memref<1x24x8xbf16, #tpu.memory_space<vmem>>, vector<1x24x8xbf16>
    %4 = vector.shape_cast %3 : vector<1x24x8xbf16> to vector<24x8xbf16>
    %c0_3 = arith.constant 0 : index
    %c0_4 = arith.constant 0 : index
    %c0_5 = arith.constant 0 : index
    %5 = vector.load %arg4[%c0_3, %c0_4, %c0_5] : memref<1x24x8xbf16, #tpu.memory_space<vmem>>, vector<1x24x8xbf16>
    %6 = vector.shape_cast %5 : vector<1x24x8xbf16> to vector<24x8xbf16>
    %cst = arith.constant dense<0.000000e+00> : vector<24x24xf32>
    %7 = tpu.matmul %4, %6, %cst {dimension_numbers = #tpu.dot_dimension_numbers<[1], [1], [0], [0], [0, 0, 1, 0], [], []>} : vector<24x8xbf16>, vector<24x8xbf16>, vector<24x24xf32> -> vector<24x24xf32>
    %cst_6 = arith.constant 0.353553385 : f32
    %8 = vector.broadcast %cst_6 : f32 to vector<24x24xf32>
    %9 = arith.mulf %7, %8 : vector<24x24xf32>
    %c24_i32 = arith.constant 24 : i32
    %10 = arith.muli %arg1, %c24_i32 : i32
    %c24_i32_7 = arith.constant 24 : i32
    %11 = arith.muli %arg2, %c24_i32_7 : i32
    %12 = tpu.iota {dimensions = array<i32: 0>} : vector<24x24xi32>
    %13 = vector.broadcast %10 : i32 to vector<24x24xi32>
    %14 = arith.addi %13, %12 : vector<24x24xi32>
    %15 = tpu.iota {dimensions = array<i32: 1>} : vector<24x24xi32>
    %16 = vector.broadcast %11 : i32 to vector<24x24xi32>
    %17 = arith.addi %16, %15 : vector<24x24xi32>
    %c8_i32 = arith.constant 8 : i32
    %18 = vector.broadcast %c8_i32 : i32 to vector<24x24xi32>
    %19 = arith.cmpi sge, %14, %18 : vector<24x24xi32>
    %20 = arith.extui %19 : vector<24x24xi1> to vector<24x24xi32>
    %c16_i32 = arith.constant 16 : i32
    %21 = vector.broadcast %c16_i32 : i32 to vector<24x24xi32>
    %22 = arith.cmpi sge, %14, %21 : vector<24x24xi32>
    %23 = arith.extui %22 : vector<24x24xi1> to vector<24x24xi32>
    %24 = arith.addi %20, %23 : vector<24x24xi32>
    %c8_i32_8 = arith.constant 8 : i32
    %25 = vector.broadcast %c8_i32_8 : i32 to vector<24x24xi32>
    %26 = arith.cmpi sge, %17, %25 : vector<24x24xi32>
    %27 = arith.extui %26 : vector<24x24xi1> to vector<24x24xi32>
    %c16_i32_9 = arith.constant 16 : i32
    %28 = vector.broadcast %c16_i32_9 : i32 to vector<24x24xi32>
    %29 = arith.cmpi sge, %17, %28 : vector<24x24xi32>
    %30 = arith.extui %29 : vector<24x24xi1> to vector<24x24xi32>
    %31 = arith.addi %27, %30 : vector<24x24xi32>
    %c8_i32_10 = arith.constant 8 : i32
    %32 = vector.broadcast %c8_i32_10 : i32 to vector<24x24xi32>
    %33 = arith.muli %24, %32 : vector<24x24xi32>
    %34 = arith.subi %14, %33 : vector<24x24xi32>
    %c8_i32_11 = arith.constant 8 : i32
    %35 = vector.broadcast %c8_i32_11 : i32 to vector<24x24xi32>
    %36 = arith.muli %31, %35 : vector<24x24xi32>
    %37 = arith.subi %17, %36 : vector<24x24xi32>
    %38 = arith.cmpi sle, %37, %34 : vector<24x24xi32>
    %c24_i32_12 = arith.constant 24 : i32
    %39 = vector.broadcast %c24_i32_12 : i32 to vector<24x24xi32>
    %40 = arith.cmpi sge, %14, %39 : vector<24x24xi32>
    %41 = arith.ori %38, %40 : vector<24x24xi1>
    %c24_i32_13 = arith.constant 24 : i32
    %42 = vector.broadcast %c24_i32_13 : i32 to vector<24x24xi32>
    %43 = arith.cmpi slt, %17, %42 : vector<24x24xi32>
    %44 = arith.andi %43, %41 : vector<24x24xi1>
    %cst_14 = arith.constant -1.000000e+30 : f32
    %45 = vector.broadcast %cst_14 : f32 to vector<24x24xf32>
    %46 = arith.select %44, %9, %45 : vector<24x24xi1>, vector<24x24xf32>
    %c0_15 = arith.constant 0 : index
    %c0_16 = arith.constant 0 : index
    %47 = vector.load %arg7[%c0_15, %c0_16] : memref<24x1xf32, #tpu.memory_space<vmem>>, vector<24x1xf32>
    %cst_17 = arith.constant dense<0xFF800000> : vector<24xf32>
    %48 = vector.multi_reduction <maximumf>, %46, %cst_17 [1] : vector<24x24xf32> to vector<24xf32>
    %49 = vector.shape_cast %48 : vector<24xf32> to vector<24x1xf32>
    %50 = arith.maximumf %47, %49 : vector<24x1xf32>
    %51 = arith.subf %47, %50 : vector<24x1xf32>
    %52 = math.exp %51 : vector<24x1xf32>
    %53 = vector.broadcast %50 : vector<24x1xf32> to vector<24x24xf32>
    %54 = arith.subf %46, %53 : vector<24x24xf32>
    %55 = math.exp %54 : vector<24x24xf32>
    %c0_18 = arith.constant 0 : index
    %c0_19 = arith.constant 0 : index
    %56 = vector.load %arg8[%c0_18, %c0_19] : memref<24x1xf32, #tpu.memory_space<vmem>>, vector<24x1xf32>
    %57 = arith.mulf %52, %56 : vector<24x1xf32>
    %cst_20 = arith.constant dense<0.000000e+00> : vector<24xf32>
    %58 = vector.multi_reduction <add>, %55, %cst_20 [1] : vector<24x24xf32> to vector<24xf32>
    %59 = vector.shape_cast %58 : vector<24xf32> to vector<24x1xf32>
    %60 = arith.addf %57, %59 : vector<24x1xf32>
    %c0_21 = arith.constant 0 : index
    %c0_22 = arith.constant 0 : index
    %61 = vector.load %arg8[%c0_21, %c0_22] : memref<24x1xf32, #tpu.memory_space<vmem>>, vector<24x1xf32>
    tpu.vector_store %arg8[%c0_21, %c0_22], %60 {strides = array<i32>} : memref<24x1xf32, #tpu.memory_space<vmem>>, vector<24x1xf32>,
    %c0_23 = arith.constant 0 : index
    %c0_24 = arith.constant 0 : index
    %62 = vector.load %arg9[%c0_23, %c0_24] : memref<24x8xf32, #tpu.memory_space<vmem>>, vector<24x8xf32>
    %63 = vector.broadcast %52 : vector<24x1xf32> to vector<24x8xf32>
    %64 = arith.mulf %63, %62 : vector<24x8xf32>
    %65 = arith.truncf %55 : vector<24x24xf32> to vector<24x24xbf16>
    %c0_25 = arith.constant 0 : index
    %c0_26 = arith.constant 0 : index
    %c0_27 = arith.constant 0 : index
    %66 = vector.load %arg5[%c0_25, %c0_26, %c0_27] : memref<1x24x8xbf16, #tpu.memory_space<vmem>>, vector<1x24x8xbf16>
    %67 = vector.shape_cast %66 : vector<1x24x8xbf16> to vector<24x8xbf16>
    %cst_28 = arith.constant dense<0.000000e+00> : vector<24x8xf32>
    %68 = tpu.matmul %65, %67, %cst_28 {dimension_numbers = #tpu.dot_dimension_numbers<[1], [0], [0], [1], [0, 0, 1, 1], [], []>} : vector<24x24xbf16>, vector<24x8xbf16>, vector<24x8xf32> -> vector<24x8xf32>
    %69 = arith.addf %64, %68 : vector<24x8xf32>
    %c0_29 = arith.constant 0 : index
    %c0_30 = arith.constant 0 : index
    %70 = vector.load %arg9[%c0_29, %c0_30] : memref<24x8xf32, #tpu.memory_space<vmem>>, vector<24x8xf32>
    tpu.vector_store %arg9[%c0_29, %c0_30], %69 {strides = array<i32>} : memref<24x8xf32, #tpu.memory_space<vmem>>, vector<24x8xf32>,
    %c0_31 = arith.constant 0 : index
    %c0_32 = arith.constant 0 : index
    %71 = vector.load %arg7[%c0_31, %c0_32] : memref<24x1xf32, #tpu.memory_space<vmem>>, vector<24x1xf32>
    tpu.vector_store %arg7[%c0_31, %c0_32], %50 {strides = array<i32>} : memref<24x1xf32, #tpu.memory_space<vmem>>, vector<24x1xf32>,
    %c0_i32_33 = arith.constant 0 : i32
    %72 = arith.cmpi eq, %arg2, %c0_i32_33 : i32
    %73 = arith.extui %72 : i1 to i32
    %c0_i32_34 = arith.constant 0 : i32
    %74 = arith.cmpi ne, %73, %c0_i32_34 : i32
    scf.if %74 {
      %c0_35 = arith.constant 0 : index
      %c0_36 = arith.constant 0 : index
      %75 = vector.load %arg9[%c0_35, %c0_36] : memref<24x8xf32, #tpu.memory_space<vmem>>, vector<24x8xf32>
      %c0_37 = arith.constant 0 : index
      %c0_38 = arith.constant 0 : index
      %76 = vector.load %arg8[%c0_37, %c0_38] : memref<24x1xf32, #tpu.memory_space<vmem>>, vector<24x1xf32>
      %77 = tpu.reciprocal %76 {approx = true} : vector<24x1xf32> -> vector<24x1xf32>
      %78 = vector.broadcast %77 : vector<24x1xf32> to vector<24x8xf32>
      %79 = arith.mulf %75, %78 : vector<24x8xf32>
      %80 = arith.truncf %79 : vector<24x8xf32> to vector<24x8xbf16>
      %c0_39 = arith.constant 0 : index
      %c0_40 = arith.constant 0 : index
      %c0_41 = arith.constant 0 : index
      %81 = vector.load %arg6[%c0_39, %c0_40, %c0_41] : memref<1x24x8xbf16, #tpu.memory_space<vmem>>, vector<1x24x8xbf16>
      %82 = vector.shape_cast %81 : vector<1x24x8xbf16> to vector<24x8xbf16>
      %83 = vector.shape_cast %80 : vector<24x8xbf16> to vector<1x24x8xbf16>
      tpu.vector_store %arg6[%c0_39, %c0_40, %c0_41], %83 {strides = array<i32>} : memref<1x24x8xbf16, #tpu.memory_space<vmem>>, vector<1x24x8xbf16>,
    } else {
    }
    return
  }
  func.func @transform_0(%arg0: i32, %arg1: i32, %arg2: i32) -> (i32, i32, i32) {
    %c0_i32 = arith.constant 0 : i32
    %c0_i32_0 = arith.constant 0 : i32
    return %arg0, %arg1, %c0_i32 : i32, i32, i32
  }
  func.func @transform_1(%arg0: i32, %arg1: i32, %arg2: i32) -> (i32, i32, i32) {
    %c0_i32 = arith.constant 0 : i32
    %c0_i32_0 = arith.constant 0 : i32
    return %arg0, %arg2, %c0_i32 : i32, i32, i32
  }
  func.func @transform_2(%arg0: i32, %arg1: i32, %arg2: i32) -> (i32, i32, i32) {
    %c0_i32 = arith.constant 0 : i32
    %c0_i32_0 = arith.constant 0 : i32
    return %arg0, %arg2, %c0_i32 : i32, i32, i32
  }
  func.func @transform_3(%arg0: i32, %arg1: i32, %arg2: i32) -> (i32, i32, i32) {
    %c0_i32 = arith.constant 0 : i32
    %c0_i32_0 = arith.constant 0 : i32
    return %arg0, %arg1, %c0_i32 : i32, i32, i32
  }
}

module attributes {stable_mosaic.version = 11 : i64} {
  func.func @_matmul_bias_kernel(%arg0: i32, %arg1: i32, %arg2: i32, %arg3: memref<48x128xbf16, #tpu.memory_space<vmem>>, %arg4: memref<128x128xbf16, #tpu.memory_space<vmem>>, %arg5: memref<1x128xf32, #tpu.memory_space<vmem>>, %arg6: memref<48x128xf32, #tpu.memory_space<vmem>>, %arg7: memref<48x128xf32, #tpu.memory_space<vmem>>) attributes {dimension_semantics = [#tpu.dimension_semantics<parallel>, #tpu.dimension_semantics<parallel>, #tpu.dimension_semantics<arbitrary>], iteration_bounds = array<i64: 1, 1, 1>, scalar_prefetch = 0 : i64, scratch_operands = 1 : i64, tpu.core_type = #tpu.core_type<tc>, window_params = [{transform_indices = @transform_0, window_bounds = array<i64: 48, 128>}, {transform_indices = @transform_1, window_bounds = array<i64: 128, 128>}, {transform_indices = @transform_2, window_bounds = array<i64: 1, 128>}, {transform_indices = @transform_3, window_bounds = array<i64: 48, 128>}]} {
    %c0_i32 = arith.constant 0 : i32
    %0 = arith.cmpi eq, %arg2, %c0_i32 : i32
    %1 = arith.extui %0 : i1 to i32
    %c0_i32_0 = arith.constant 0 : i32
    %2 = arith.cmpi ne, %1, %c0_i32_0 : i32
    scf.if %2 {
      %c0_10 = arith.constant 0 : index
      %c0_11 = arith.constant 0 : index
      %12 = vector.load %arg5[%c0_10, %c0_11] : memref<1x128xf32, #tpu.memory_space<vmem>>, vector<1x128xf32>
      %13 = vector.shape_cast %12 : vector<1x128xf32> to vector<1x128xf32>
      %14 = vector.broadcast %13 : vector<1x128xf32> to vector<48x128xf32>
      %c0_12 = arith.constant 0 : index
      %c0_13 = arith.constant 0 : index
      %15 = vector.load %arg7[%c0_12, %c0_13] : memref<48x128xf32, #tpu.memory_space<vmem>>, vector<48x128xf32>
      tpu.vector_store %arg7[%c0_12, %c0_13], %14 {strides = array<i32>} : memref<48x128xf32, #tpu.memory_space<vmem>>, vector<48x128xf32>,
    } else {
    }
    %c0 = arith.constant 0 : index
    %c0_1 = arith.constant 0 : index
    %3 = vector.load %arg7[%c0, %c0_1] : memref<48x128xf32, #tpu.memory_space<vmem>>, vector<48x128xf32>
    %c0_2 = arith.constant 0 : index
    %c0_3 = arith.constant 0 : index
    %4 = vector.load %arg3[%c0_2, %c0_3] : memref<48x128xbf16, #tpu.memory_space<vmem>>, vector<48x128xbf16>
    %c0_4 = arith.constant 0 : index
    %c0_5 = arith.constant 0 : index
    %5 = vector.load %arg4[%c0_4, %c0_5] : memref<128x128xbf16, #tpu.memory_space<vmem>>, vector<128x128xbf16>
    %cst = arith.constant dense<0.000000e+00> : vector<48x128xf32>
    %6 = tpu.matmul %4, %5, %cst {dimension_numbers = #tpu.dot_dimension_numbers<[1], [0], [0], [1], [0, 0, 1, 1], [], []>} : vector<48x128xbf16>, vector<128x128xbf16>, vector<48x128xf32> -> vector<48x128xf32>
    %7 = arith.addf %3, %6 : vector<48x128xf32>
    %c0_6 = arith.constant 0 : index
    %c0_7 = arith.constant 0 : index
    %8 = vector.load %arg7[%c0_6, %c0_7] : memref<48x128xf32, #tpu.memory_space<vmem>>, vector<48x128xf32>
    tpu.vector_store %arg7[%c0_6, %c0_7], %7 {strides = array<i32>} : memref<48x128xf32, #tpu.memory_space<vmem>>, vector<48x128xf32>,
    %c0_i32_8 = arith.constant 0 : i32
    %9 = arith.cmpi eq, %arg2, %c0_i32_8 : i32
    %10 = arith.extui %9 : i1 to i32
    %c0_i32_9 = arith.constant 0 : i32
    %11 = arith.cmpi ne, %10, %c0_i32_9 : i32
    scf.if %11 {
      %c0_10 = arith.constant 0 : index
      %c0_11 = arith.constant 0 : index
      %12 = vector.load %arg7[%c0_10, %c0_11] : memref<48x128xf32, #tpu.memory_space<vmem>>, vector<48x128xf32>
      %c0_12 = arith.constant 0 : index
      %c0_13 = arith.constant 0 : index
      %13 = vector.load %arg6[%c0_12, %c0_13] : memref<48x128xf32, #tpu.memory_space<vmem>>, vector<48x128xf32>
      tpu.vector_store %arg6[%c0_12, %c0_13], %12 {strides = array<i32>} : memref<48x128xf32, #tpu.memory_space<vmem>>, vector<48x128xf32>,
    } else {
    }
    return
  }
  func.func @transform_0(%arg0: i32, %arg1: i32, %arg2: i32) -> (i32, i32) {
    %c0_i32 = arith.constant 0 : i32
    return %arg0, %arg2 : i32, i32
  }
  func.func @transform_1(%arg0: i32, %arg1: i32, %arg2: i32) -> (i32, i32) {
    %c0_i32 = arith.constant 0 : i32
    return %arg2, %arg1 : i32, i32
  }
  func.func @transform_2(%arg0: i32, %arg1: i32, %arg2: i32) -> (i32, i32) {
    %c0_i32 = arith.constant 0 : i32
    %c0_i32_0 = arith.constant 0 : i32
    return %c0_i32, %arg1 : i32, i32
  }
  func.func @transform_3(%arg0: i32, %arg1: i32, %arg2: i32) -> (i32, i32) {
    %c0_i32 = arith.constant 0 : i32
    return %arg0, %arg1 : i32, i32
  }
}

</mosaic_0001>

<bundles_post_ra>
// kernel: cca_attention_pallas.3
= control target key start
LH: loop header
LB: loop body
LE: loop exit
PB: predicated region body
PF: predicated region fallthrough
CT: control target
= control target key end

     0   :  { %v347_v0 = vmov 0.0   ;;  %vm348_vm0 = vmmov 0   ;;  %s417_s1 = inlined_call_operand.vmem [shape: bf16[128,128], index: 1, kind: input, shape index: {}]   ;;  %s418_s0 = inlined_call_operand.vmem [shape: bf16[48,128], index: 0, kind: input, shape index: {}]   ;;  %s419_s2 = inlined_call_operand.vmem [shape: f32[1,128], index: 2, kind: input, shape index: {}]   ;;  %s420_s3 = inlined_call_operand.vmem [shape: bf16[48,128], index: 3, kind: output, shape index: {}]  }
   0x1   :  { %318 = vmatprep.subr.bf16.mxu1 %v347_v0  ;;  %v336_v1 = vld [vmem:[%s417_s1] sm:$0xff]   ;;  %290 = vmatprep.subr.bf16.mxu0 %v347_v0  ;;  %v337_v2 = vld [vmem:[%s417_s1 + $0x8] sm:$0xff]   ;;  %v338_v3 = vld [vmem:[%s417_s1 + $0x10] sm:$0xff]  }
   0x2   :  { %310 = vmatprep.mubr.msk.bf16.mxu1 %vm348_vm0, %v347_v0  ;;  %306 = vmatprep.mubr.msk.bf16.mxu0 %vm348_vm0, %v347_v0  ;;  %v339_v4 = vld [vmem:[%s417_s1 + $0x18] sm:$0xff]   ;;  %v340_v5 = vld [vmem:[%s417_s1 + $0x20] sm:$0xff]   ;;  %v341_v6 = vld [vmem:[%s417_s1 + $0x28] sm:$0xff]  }
   0x3   :  { %326 = vmatpush3.bf16.msra.mxu1 %v336_v1  ;;  %291 = vmatpush3.bf16.msra.mxu0 %v336_v1  ;;  %v342_v7 = vld [vmem:[%s417_s1 + $0x30] sm:$0xff]   ;;  %v343_v8 = vld [vmem:[%s417_s1 + $0x38] sm:$0xff]   ;;  %v344_v9 = vld [vmem:[%s418_s0 + $0x8] sm:$0xff]  }
   0x4   :  { %319 = vmatprep.subr.bf16.mxu1 %v347_v0  ;;  %292 = vmatprep.subr.bf16.mxu0 %v347_v0  ;;  %v345_v10 = vld [vmem:[%s418_s0] sm:$0xff]   ;;  %v346_v11 = vld [vmem:[%s418_s0 + $0x10] sm:$0xff]  }
   0x5   :  { %v238_v12 = vld [vmem:[%s419_s2] ss:$0 sm:$0xff] }
   0x7   :  { %327 = vmatpush3.bf16.msra.mxu1 %v337_v2  ;;  %293 = vmatpush3.bf16.msra.mxu0 %v337_v2 }
   0x8   :  { %320 = vmatprep.subr.bf16.mxu1 %v347_v0  ;;  %294 = vmatprep.subr.bf16.mxu0 %v347_v0 }
   0xb   :  { %328 = vmatpush3.bf16.msra.mxu1 %v338_v3  ;;  %295 = vmatpush3.bf16.msra.mxu0 %v338_v3 }
   0xc   :  { %321 = vmatprep.subr.bf16.mxu1 %v347_v0  ;;  %296 = vmatprep.subr.bf16.mxu0 %v347_v0 }
   0xf   :  { %329 = vmatpush3.bf16.msra.mxu1 %v339_v4  ;;  %297 = vmatpush3.bf16.msra.mxu0 %v339_v4 }
  0x10   :  { %322 = vmatprep.subr.bf16.mxu1 %v347_v0  ;;  %298 = vmatprep.subr.bf16.mxu0 %v347_v0 }
  0x13   :  { %330 = vmatpush3.bf16.msra.mxu1 %v340_v5  ;;  %299 = vmatpush3.bf16.msra.mxu0 %v340_v5 }
  0x14   :  { %323 = vmatprep.subr.bf16.mxu1 %v347_v0  ;;  %300 = vmatprep.subr.bf16.mxu0 %v347_v0 }
  0x17   :  { %331 = vmatpush3.bf16.msra.mxu1 %v341_v6  ;;  %301 = vmatpush3.bf16.msra.mxu0 %v341_v6 }
  0x18   :  { %324 = vmatprep.subr.bf16.mxu1 %v347_v0  ;;  %302 = vmatprep.subr.bf16.mxu0 %v347_v0 }
  0x1b   :  { %332 = vmatpush3.bf16.msra.mxu1 %v342_v7  ;;  %303 = vmatpush3.bf16.msra.mxu0 %v342_v7 }
  0x1c   :  { %325 = vmatprep.subr.bf16.mxu1 %v347_v0  ;;  %304 = vmatprep.subr.bf16.mxu0 %v347_v0 }
  0x1f   :  { %333 = vmatpush3.bf16.msra.mxu1 %v343_v8  ;;  %305 = vmatpush3.bf16.msra.mxu0 %v343_v8 }
  0x22   :  { %311 = vmatmul.mubr.bf16.vlgmr.msra.gmra.mrb[0].mxu1 %v344_v9  ;;  %307 = vmatmul.mubr.bf16.vlgmr.msra.gmra.mrb[0].mxu0 %v345_v10 }
  0x23   :  { %314 = vmatprep.mubr.msk.bf16.mxu1 %vm348_vm0, %v347_v0 }
  0x2a   :  { %315 = vmatmul.mubr.bf16.gmra.mrb[4].mxu1 %v346_v11 }
  0xf5   :  { %v168_v13 = vpop.f32.mrb[0].mxu1  ;;  %v160_v14 = vpop.f32.mrb[0].mxu0 }
  0xf6   :  { %v312_v15 = vpop.f32.mrb[1].mxu1  ;;  %v183_v16 = vadd.f32 %v238_v12, %v160_v14  ;;  %v308_v17 = vpop.f32.mrb[1].mxu0  ;;  %v185_v20 = vadd.f32 %v238_v12, %v168_v13 }
  0xf7   :  { %v171_v18 = vpop.f32.mrb[2].mxu1  ;;  %v163_v19 = vpop.f32.mrb[2].mxu0 }
  0xf8   :  { %v186_v21 = vadd.f32 %v238_v12, %v171_v18  ;;  %v313_v22 = vpop.f32.mrb[3].mxu1  ;;  %v184_v23 = vadd.f32 %v238_v12, %v163_v19  ;;  %v309_v24 = vpop.f32.mrb[3].mxu0 }
  0xfa   :  { %v270_v25 = vpack.c.bf16 %v186_v21, %v185_v20  ;;  %v265_v26 = vpack.c.bf16 %v184_v23, %v183_v16 }
  0xfc   :  { %277 = vst [vmem:[%s420_s3 + $0x8] sm:$0xff] %v270_v25   ;;  %266 = vst [vmem:[%s420_s3] sm:$0xff] %v265_v26  }
  0xfd   :  { %v176_v27 = vpop.f32.mrb[4].mxu1 }
  0xfe   :  { %v316_v28 = vpop.f32.mrb[5].mxu1  ;;  %v187_v30 = vadd.f32 %v238_v12, %v176_v27 }
  0xff   :  { %v179_v29 = vpop.f32.mrb[6].mxu1 }
 0x100   :  { %v188_v31 = vadd.f32 %v238_v12, %v179_v29  ;;  %v317_v32 = vpop.f32.mrb[7].mxu1 }
 0x102   :  { %v275_v33 = vpack.c.bf16 %v188_v31, %v187_v30 }
 0x104   :  { %278 = vst [vmem:[%s420_s3 + $0x10] sm:$0xff] %v275_v33  }

// kernel: cca_attention_pallas.5
= control target key start
LH: loop header
LB: loop body
LE: loop exit
PB: predicated region body
PF: predicated region fallthrough
CT: control target
= control target key end

     0   :  { %v334_v1 = vmov 0.0   ;;  %vm335_vm0 = vmmov 0   ;;  %s410_s0 = inlined_call_operand.vmem [shape: bf16[48,128], index: 0, kind: input, shape index: {}]   ;;  %s411_s1 = inlined_call_operand.vmem [shape: bf16[128,128], index: 1, kind: input, shape index: {}]   ;;  %s412_s2 = inlined_call_operand.vmem [shape: f32[1,128], index: 2, kind: input, shape index: {}]   ;;  %s413_s3 = inlined_call_operand.hbm [shape: f32[48,128], index: 3, kind: output, shape index: {}]  }
   0x1   :  { %v299_v0 = vld [vmem:[%s411_s1] sm:$0xff]   ;;  %278 = vmatprep.subr.bf16.mxu1 %v334_v1  ;;  %250 = vmatprep.subr.bf16.mxu0 %v334_v1  ;;  %v300_v2 = vld [vmem:[%s411_s1 + $0x8] sm:$0xff]   ;;  %v301_v3 = vld [vmem:[%s411_s1 + $0x10] sm:$0xff]  }
   0x2   :  { %286 = vmatpush3.bf16.msra.mxu1 %v299_v0  ;;  %251 = vmatpush3.bf16.msra.mxu0 %v299_v0  ;;  %v302_v4 = vld [vmem:[%s411_s1 + $0x18] sm:$0xff]  }
   0x3   :  { %279 = vmatprep.subr.bf16.mxu1 %v334_v1  ;;  %252 = vmatprep.subr.bf16.mxu0 %v334_v1 }
   0x4   :  { %270 = vmatprep.mubr.msk.bf16.mxu1 %vm335_vm0, %v334_v1  ;;  %266 = vmatprep.mubr.msk.bf16.mxu0 %vm335_vm0, %v334_v1 }
   0x6   :  { %287 = vmatpush3.bf16.msra.mxu1 %v300_v2  ;;  %253 = vmatpush3.bf16.msra.mxu0 %v300_v2 }
   0x7   :  { %280 = vmatprep.subr.bf16.mxu1 %v334_v1  ;;  %254 = vmatprep.subr.bf16.mxu0 %v334_v1 }
   0xa   :  { %288 = vmatpush3.bf16.msra.mxu1 %v301_v3  ;;  %255 = vmatpush3.bf16.msra.mxu0 %v301_v3 }
   0xb   :  { %281 = vmatprep.subr.bf16.mxu1 %v334_v1  ;;  %256 = vmatprep.subr.bf16.mxu0 %v334_v1 }
   0xc   :  { %8 = vsyncpa [#allocation4], 0  ;;  %v303_v5 = vld [vmem:[%s411_s1 + $0x20] sm:$0xff]   ;;  %v304_v6 = vld [vmem:[%s411_s1 + $0x28] sm:$0xff]  }
   0xd   :  { %v305_v7 = vld [vmem:[%s411_s1 + $0x30] sm:$0xff]   ;;  %v306_v8 = vld [vmem:[%s411_s1 + $0x38] sm:$0xff]   ;;  %v307_v9 = vld [vmem:[%s410_s0 + $0x8] sm:$0xff]  }
   0xe   :  { %289 = vmatpush3.bf16.msra.mxu1 %v302_v4  ;;  %257 = vmatpush3.bf16.msra.mxu0 %v302_v4  ;;  %v308_v10 = vld [vmem:[%s410_s0] sm:$0xff]   ;;  %v309_v11 = vld [vmem:[%s410_s0 + $0x10] sm:$0xff]   ;;  %s336_s0 = smov [#allocation3]  }
   0xf   :  { %282 = vmatprep.subr.bf16.mxu1 %v334_v1  ;;  %258 = vmatprep.subr.bf16.mxu0 %v334_v1  ;;  %v227_v12 = vld [vmem:[%s412_s2] ss:$0 sm:$0xff]  ;;  %s216_s8 = sshll.u32 %s336_s0, 4  ;;  %s217_s8 = int_to_ptr.vmem [resolvable:$true] %s216_s8 }
  0x10   :  { %s310_s2 = scalar_lea.vmem %s217_s8, 768  ;;  %p315_p1 = scmp.lt.s32.totalorder %s217_s8, %s217_s8 }
  0x11   :  { %p311_p0 = scmp.ne.s32.totalorder %s217_s8, %s310_s2  ;;  %p316_p2 = scmp.lt.s32.totalorder %s310_s2, %s310_s2 }
  0x12   :  { %290 = vmatpush3.bf16.msra.mxu1 %v303_v5  ;;  %259 = vmatpush3.bf16.msra.mxu0 %v303_v5 }
  0x13   :  { %283 = vmatprep.subr.bf16.mxu1 %v334_v1  ;;  %260 = vmatprep.subr.bf16.mxu0 %v334_v1  ;;  %p317_p3 = por %p316_p2, %p315_p1 }
  0x15   :  { %p318_p4 = pnand %p317_p3, %p311_p0 }
  0x16   :  { %291 = vmatpush3.bf16.msra.mxu1 %v304_v6  ;;  %261 = vmatpush3.bf16.msra.mxu0 %v304_v6 }
  0x17   :  { %284 = vmatprep.subr.bf16.mxu1 %v334_v1  ;;  %262 = vmatprep.subr.bf16.mxu0 %v334_v1 }
  0x1a   :  { %292 = vmatpush3.bf16.msra.mxu1 %v305_v7  ;;  %263 = vmatpush3.bf16.msra.mxu0 %v305_v7 }
  0x1b   :  { %285 = vmatprep.subr.bf16.mxu1 %v334_v1  ;;  %264 = vmatprep.subr.bf16.mxu0 %v334_v1 }
  0x1e   :  { %293 = vmatpush3.bf16.msra.mxu1 %v306_v8  ;;  %265 = vmatpush3.bf16.msra.mxu0 %v306_v8 }
  0x21   :  { %271 = vmatmul.mubr.bf16.vlgmr.msra.gmra.mrb[0].mxu1 %v307_v9  ;;  %267 = vmatmul.mubr.bf16.vlgmr.msra.gmra.mrb[0].mxu0 %v308_v10 }
  0x22   :  { %274 = vmatprep.mubr.msk.bf16.mxu1 %vm335_vm0, %v334_v1 }
  0x29   :  { %275 = vmatmul.mubr.bf16.gmra.mrb[4].mxu1 %v309_v11 }
  0xf4   :  { %v169_v13 = vpop.f32.mrb[0].mxu1  ;;  %v161_v14 = vpop.f32.mrb[0].mxu0 }
  0xf5   :  { %v186_v15 = vadd.f32 %v227_v12, %v169_v13  ;;  %v272_v16 = vpop.f32.mrb[1].mxu1  ;;  %v184_v17 = vadd.f32 %v227_v12, %v161_v14  ;;  %v268_v18 = vpop.f32.mrb[1].mxu0 }
  0xf6   :  { %v172_v19 = vpop.f32.mrb[2].mxu1  ;;  %v164_v20 = vpop.f32.mrb[2].mxu0 }
  0xf7   :  { %207 = vst [vmem:[#allocation3 + $0x10] sm:$0xff] %v186_v15  ;;  %v187_v21 = vadd.f32 %v227_v12, %v172_v19  ;;  %v273_v22 = vpop.f32.mrb[3].mxu1  ;;  %205 = vst [vmem:[#allocation3] sm:$0xff] %v184_v17  ;;  %v185_v23 = vadd.f32 %v227_v12, %v164_v20  ;;  %v269_v24 = vpop.f32.mrb[3].mxu0 }
  0xf9   :  { %208 = vst [vmem:[#allocation3 + $0x18] sm:$0xff] %v187_v21  ;;  %206 = vst [vmem:[#allocation3 + $0x8] sm:$0xff] %v185_v23 }
  0xfc   :  { %v177_v25 = vpop.f32.mrb[4].mxu1 }
  0xfd   :  { %v188_v26 = vadd.f32 %v227_v12, %v177_v25  ;;  %v276_v27 = vpop.f32.mrb[5].mxu1 }
  0xfe   :  { %v180_v28 = vpop.f32.mrb[6].mxu1 }
  0xff   :  { %209 = vst [vmem:[#allocation3 + $0x20] sm:$0xff] %v188_v26  ;;  %v189_v29 = vadd.f32 %v227_v12, %v180_v28  ;;  %v277_v30 = vpop.f32.mrb[7].mxu1 }
 0x101   :  { %210 = vst [vmem:[#allocation3 + $0x28] sm:$0xff] %v189_v29 }
 0x102   :  { %321 = shalt.err (!%p318_p4)
}
 0x103   :  { %s322_s11 = scalar_lea.hbm %s413_s3, 768 }
 0x104   :  { %p323_p5 = scmp.ne.s32.totalorder %s413_s3, %s322_s11  ;;  %p326_p6 = scmp.lt.u32.totalorder %s322_s11, %s413_s3 }
 0x106   :  { %p328_p7 = pnand %p326_p6, %p323_p5 }
 0x108   :  { %331 = shalt.err (!%p328_p7)
}
 0x109   :  { %s337_s16 = smov 128   ;;  %s338_s17 = smov 8  }
 0x10a   :  { %222 = dma.vmem_to_hbm [thread:$0]  %s217_s8, 768, %s413_s3, [#allocation4], %s337_s16, %s337_s16, %s338_s17  }
 0x10b   :  { %332 = dma.done.wait [#allocation4], 768  }
 0x10c   :  { %333 = vsyncadd [#allocation4], 4294966528 }
 0x10d   :  { %226 = vsyncpa [#allocation4], 1 }

// kernel: cca_attention_pallas.4
= control target key start
LH: loop header
LB: loop body
LE: loop exit
PB: predicated region body
PF: predicated region fallthrough
CT: control target
= control target key end

     0   :  { %s952_s12 = smov 0   ;;  %s954_s13 = smov 0   ;;  %s1029_s0 = inlined_call_operand.vmem [shape: bf16[8,24,8], index: 0, kind: input, shape index: {}]   ;;  %s1030_s1 = inlined_call_operand.vmem [shape: bf16[8,24,8], index: 1, kind: input, shape index: {}]   ;;  %s1031_s2 = inlined_call_operand.vmem [shape: bf16[8,24,8], index: 2, kind: input, shape index: {}]   ;;  %s1032_s3 = inlined_call_operand.vmem [shape: bf16[8,24,8], index: 3, kind: output, shape index: {}]  }
   0x1   :  { %s956_s14 = smov 0  }
   0x2 LB: > { %s32_s15 = sadd.s32 1, %s923_s13  ;;  %p799_p0 = scmp.ge.s32.totalorder %s927_s14, 1  ;;  %s927_s14 = sphi %s956_s14, %s13_s14   ;;  %s923_s13 = sphi %s954_s13, %s1034_s13   ;;  %s919_s12 = sphi %s952_s12, %s1033_s12  }
   0x3   : > { %p34_p1 = scmp.ge.s32.totalorder %s32_s15, 8  ;;  %p199_p2 = scmp.lt.s32.totalorder %s927_s14, 9 }
   0x5   : > { %s1036_s15 = smov (%p34_p1, %s32_s15), 0  ;;  %p200_p3 = pnand %p799_p0, %p199_p2 }
   0x6   : > { %p250_p4 = scmp.lt.s32.totalorder (!%p200_p3), %s919_s12, 7  ;;  %vm301_vm0 = vcmask (!%p200_p3), 64512   ;;  %v929_v6 = vmov (!%p200_p3), 0   ;;  %vm294_vm1 = vcmask (!%p200_p3), 7168   ;;  %v930_v7 = vmov (!%p200_p3), -1e+30  }
   0x7   : > { %203 = sbr.rel (%p200_p3) target bundleno = 845 (0x34d), region = 32  ;;  %879 = vset.pattern.permute.xlu1 (!%p200_p3), %v929_v6  ;;  %880 = vset.pattern.permute.xlu0 (!%p200_p3), %v929_v6  ;;  %297 = vst.msk [vmem:[#allocation2 + $0x10] sm:$0xff] (!%p200_p3), %vm294_vm1, %v930_v7  ;;  %295 = vst.msk [vmem:[#allocation2] sm:$0xff] (!%p200_p3), %vm294_vm1, %v930_v7  ;;  %v393_v8 = vlaneseq (!%p200_p3)  ;;  %vm452_vm9 = vcmask (!%p200_p3), 195584   ;;  %v931_v33 = vmov (!%p200_p3), 0.0   ;;  %vm561_vm12 = vcmask (!%p200_p3), 1043456  }
   0x8   : > { %296 = vst.msk [vmem:[#allocation2 + $0x8] sm:$0xff] (!%p200_p3), %vm294_vm1, %v930_v7  ;;  %298 = vst.msk [vmem:[#allocation3] sm:$0xff] (!%p200_p3), %vm294_vm1, %v931_v33  ;;  %vm665_vm13 = vcmask (!%p200_p3), 60416  }
   0x9   : > { %v402_v9 = vand.u32 (!%p200_p3), 127, %v393_v8  ;;  %v394_v12 = vshrl.u32 (!%p200_p3), %v393_v8, 7  ;;  %302 = vst.msk [vmem:[#allocation4] sm:$0xff] (!%p200_p3), %vm301_vm0, %v931_v33  ;;  %303 = vst.msk [vmem:[#allocation4 + $0x8] sm:$0xff] (!%p200_p3), %vm301_vm0, %v931_v33 }
   0xa   : > { %304 = vst.msk [vmem:[#allocation4 + $0x10] sm:$0xff] (!%p200_p3), %vm301_vm0, %v931_v33 }
   0xb   : > { %vm420_vm2 = vcmp.ge.s32.totalorder (!%p200_p3), %v402_v9, 8  ;;  %vm422_vm3 = vcmp.ge.s32.totalorder (!%p200_p3), %v402_v9, 16  ;;  %v396_v14 = vadd.s32 (!%p200_p3), 16, %v394_v12  ;;  %v395_v16 = vadd.s32 (!%p200_p3), 8, %v394_v12  ;;  %299 = vst.msk [vmem:[#allocation3 + $0x8] sm:$0xff] (!%p200_p3), %vm294_vm1, %v931_v33  ;;  %300 = vst.msk [vmem:[#allocation3 + $0x10] sm:$0xff] (!%p200_p3), %vm294_vm1, %v931_v33 }
   0xc   : > { %v421_v10 = vsel (!%p200_p3), %vm420_vm2, 1, %v929_v6  ;;  %v423_v11 = vsel (!%p200_p3), %vm422_vm3, 1, %v929_v6  ;;  %vm442_vm5 = vcmp.lt.s32.totalorder (!%p200_p3), %v402_v9, 24 }
   0xd   : > { %v424_v13 = vadd.s32 (!%p200_p3), %v423_v11, %v421_v10  ;;  %v811_v17 = vadd.s32 (!%p200_p3), 4294967280, %v396_v14  ;;  %v810_v19 = vadd.s32 (!%p200_p3), 4294967288, %v395_v16 }
   0xe   : > { %s1038_s12 = smov (!%p250_p4, %s919_s12), 7  ;;  %v451_v34 = vld [vmem:[#allocation2 + $0x10] sm:$0xff]  ;;  %v449_v35 = vld [vmem:[#allocation2] sm:$0xff] }
   0xf   : > { %s970_s16 = smul.u32 12, %s1038_s12  ;;  %v431_v15 = vmul.u32 8, %v424_v13  ;;  %v450_v41 = vld [vmem:[#allocation2 + $0x8] sm:$0xff]  ;;  %v498_v8 = vld [vmem:[#allocation3] sm:$0xff] }
  0x11   : > { %s267_s19 = scalar_lea.vmem %s1030_s1, %s970_s16  ;;  %s257_s22 = scalar_lea.vmem %s1029_s0, %s970_s16  ;;  %v432_v18 = vsub.s32 %v402_v9, %v431_v15 }
  0x12   : > { %v881_v0 = vld [vmem:[%s267_s19] sm:$0xff]   ;;  %v882_v1 = vld [vmem:[%s267_s19 + $0x8] ss:$0 sps:$4 sm:$0xff]   ;;  %s277_s25 = scalar_lea.vmem %s1031_s2, %s970_s16  ;;  %s287_s28 = scalar_lea.vmem %s1032_s3, %s970_s16 }
  0x13   : > { %v883_v2 = vld [vmem:[%s257_s22] sm:$0xff]   ;;  %848 = vmatprep.subr.msk.bf16.mxu0 %vm301_vm0, %v881_v0  ;;  %v335_v3 = vsel %vm301_vm0, %v881_v0, 0  ;;  %v338_v4 = vsel %vm301_vm0, %v882_v1, 0  ;;  %v884_v5 = vld [vmem:[%s257_s22 + $0x8] ss:$0 sps:$4 sm:$0xff]   ;;  %vm435_vm4 = vcmp.le.s32.totalorder %v432_v18, %v811_v17  ;;  %vm433_vm6 = vcmp.le.s32.totalorder %v432_v18, %v394_v12 }
  0x14   : > { %833 = vmatpush3.bf16.xpose.msra.mxu0 %v335_v3  ;;  %836 = vmatprep.mubr.msk.bf16.mxu0 %vm301_vm0, %v883_v2  ;;  %vm445_vm7 = vmand %vm442_vm5, %vm435_vm4  ;;  %vm434_vm8 = vcmp.le.s32.totalorder %v432_v18, %v810_v19  ;;  %v885_v46 = vld [vmem:[%s277_s25] sm:$0xff]   ;;  %v886_v47 = vld [vmem:[%s277_s25 + $0x8] ss:$0 sps:$4 sm:$0xff]  }
  0x15   : > { %849 = vmatprep.subr.msk.bf16.mxu0 %vm301_vm0, %v882_v1  ;;  %vm443_vm10 = vmand %vm442_vm5, %vm433_vm6  ;;  %840 = vmatprep.subr.bf16.mxu1 %v885_v46  ;;  %v563_v48 = vsel %vm561_vm12, %v886_v47, 0  ;;  %v500_v11 = vld [vmem:[#allocation3 + $0x10] sm:$0xff]  ;;  %v499_v13 = vld [vmem:[#allocation3 + $0x8] sm:$0xff] }
  0x16   : > { %vm444_vm11 = vmand %vm442_vm5, %vm434_vm8  ;;  %841 = vmatpush3.bf16.msra.mxu1 %v885_v46 }
  0x17   : > { %850 = vmatprep.subr.msk.bf16.mxu1 %vm561_vm12, %v886_v47 }
  0x1a   : > { %843 = vmatpush3.bf16.msra.mxu1 %v563_v48 }
  0x1c   : > { %835 = vmatpush3.bf16.xpose.msra.mxu0 %v338_v4 }
  0x23   : > { %837 = vmatmul.mubr.msk.bf16.vlgmr.msra.gmra.mrb[0].mxu0 %vm301_vm0, %v884_v5 }
  0xf6   : > { %v838_v20 = vpop.f32.mrb[0].mxu0 }
  0xf7   : > { %v390_v21 = vmul.f32 0.35355338, %v838_v20  ;;  %v374_v22 = vpop.f32.mrb[1].mxu0 }
  0xf8   : > { %v388_v23 = vmul.f32 0.35355338, %v374_v22  ;;  %v839_v24 = vpop.f32.mrb[2].mxu0 }
  0xf9   : > { %v377_v25 = vpop.f32.mrb[3].mxu0  ;;  %v448_v26 = vsel %vm445_vm7, %v390_v21, -1e+30 }
  0xfa   : > { %v389_v27 = vmul.f32 0.35355338, %v377_v25  ;;  %v459_v28 = vsel %vm452_vm9, %v448_v26, -inf  ;;  %v446_v29 = vsel %vm443_vm10, %v388_v23, -1e+30 }
  0xfb   : > { %460 = vmax.xlane.f32.xlu1 %v459_v28  ;;  %v453_v30 = vsel %vm452_vm9, %v446_v29, -inf }
  0xfc   : > { %454 = vmax.xlane.f32.xlu0 %v453_v30  ;;  %v447_v31 = vsel %vm444_vm11, %v389_v27, -1e+30  ;;  %v522_v27 = vld [vmem:[#allocation4 + $0x10] sm:$0xff] }
  0xfd   : > { %v456_v32 = vsel %vm452_vm9, %v447_v31, -inf }
 0x100   : > { %457 = vmax.xlane.f32.xlu0 %v456_v32 }
 0x188   : > { %v461_v36 = vpop.xlane.xlu1 %460 }
 0x189   : > { %v464_v37 = vmax.f32 %v451_v34, %v461_v36  ;;  %v455_v38 = vpop.xlane.xlu0 %454 }
 0x18a   : > { %v462_v39 = vmax.f32 %v449_v35, %v455_v38 }
 0x18b   : > { %v467_v40 = vsub.f32 %v451_v34, %v464_v37  ;;  %621 = vst.msk [vmem:[#allocation2 + $0x10] sm:$0xff] %vm294_vm1, %v464_v37 }
 0x18c   : > { %v465_v42 = vsub.f32 %v449_v35, %v462_v39  ;;  %619 = vst.msk [vmem:[#allocation2] sm:$0xff] %vm294_vm1, %v462_v39  ;;  %476 = vperm.xlu1 %879, %v462_v39  }
 0x18d   : > { %v458_v43 = vpop.xlane.xlu0 %457  ;;  %v472_v4 = vmul.f32 1.442695, %v467_v40 }
 0x18e   : > { %v463_v44 = vmax.f32 %v450_v41, %v458_v43  ;;  %v468_v2 = vmul.f32 1.442695, %v465_v42 }
 0x190   : > { %v466_v45 = vsub.f32 %v450_v41, %v463_v44  ;;  %620 = vst.msk [vmem:[#allocation2 + $0x8] sm:$0xff] %vm294_vm1, %v463_v44  ;;  %486 = vperm.xlu1 %879, %v464_v37   ;;  %481 = vperm.xlu0 %880, %v463_v44  }
 0x192   : > { %v470_v3 = vmul.f32 1.442695, %v466_v45 }
 0x20b   : > { %v477_v49 = vpop.permute.xlu1 %476 }
 0x20c   : > { %v489_v50 = vsub.f32 %v446_v29, %v477_v49  ;;  %v520_v29 = vld [vmem:[#allocation4] sm:$0xff] }
 0x20e   : > { %v492_v51 = vmul.f32 1.442695, %v489_v50 }
 0x20f   : > { %v487_v52 = vpop.permute.xlu1 %486  ;;  %v482_v53 = vpop.permute.xlu0 %481 }
 0x210   : > { %887 = vpow2.f32 %v492_v51  ;;  %v491_v54 = vsub.f32 %v448_v26, %v487_v52  ;;  %v490_v55 = vsub.f32 %v447_v31, %v482_v53  ;;  %v521_v31 = vld [vmem:[#allocation4 + $0x8] sm:$0xff] }
 0x212   : > { %v496_v56 = vmul.f32 1.442695, %v491_v54  ;;  %v494_v57 = vmul.f32 1.442695, %v490_v55 }
 0x214   : > { %889 = vpow2.f32 %v496_v56 }
 0x215   : > { %891 = vpow2.f32 %v494_v57 }
 0x216   : > { %893 = vpow2.f32 %v468_v2 }
 0x217   : > { %895 = vpow2.f32 %v470_v3 }
 0x218   : > { %897 = vpow2.f32 %v472_v4 }
 0x21a   : > { %v888_v58 = vpop.eup %887 }
 0x21b   : > { %v504_v59 = vsel %vm452_vm9, %v888_v58, 0.0 }
 0x21c   : > { %505 = vadd.xlane.f32.xlu1 %v504_v59 }
 0x21e   : > { %v890_v60 = vpop.eup %889 }
 0x21f   : > { %v892_v61 = vpop.eup %891  ;;  %v510_v62 = vsel %vm452_vm9, %v890_v60, 0.0  ;;  %v542_v63 = vpack.c.bf16 %v890_v60, %v890_v60 }
 0x220   : > { %511 = vadd.xlane.f32.xlu1 %v510_v62  ;;  %v507_v0 = vsel %vm452_vm9, %v892_v61, 0.0  ;;  %v541_v1 = vpack.c.bf16 %v892_v61, %v888_v58  ;;  %v894_v5 = vpop.eup %893 }
 0x221   : > { %508 = vadd.xlane.f32.xlu0 %v507_v0  ;;  %v896_v6 = vpop.eup %895  ;;  %v501_v9 = vmul.f32 %v894_v5, %v498_v8 }
 0x222   : > { %844 = vmatprep.mubr.msk.bf16.mxu1 %vm452_vm9, %v541_v1  ;;  %v898_v7 = vpop.eup %897  ;;  %v502_v16 = vmul.f32 %v896_v6, %v499_v13 }
 0x223   : > { %845 = vmatmul.mubr.msk.bf16.vlgmr.msra.gmra.mrb[0].mxu1 %vm452_vm9, %v542_v63  ;;  %v503_v14 = vmul.f32 %v898_v7, %v500_v11 }
 0x231   : > { %525 = vperm.xlu1 %879, %v894_v5  }
 0x235   : > { %530 = vperm.xlu1 %879, %v896_v6  }
 0x237   : > { %535 = vperm.xlu0 %880, %v898_v7  }
 0x2a9   : > { %v506_v10 = vpop.xlane.xlu1 %505 }
 0x2aa   : > { %v513_v12 = vadd.f32 %v506_v10, %v501_v9 }
 0x2ac   : > { %517 = vst.msk [vmem:[#allocation3] sm:$0xff] %vm294_vm1, %v513_v12 }
 0x2ad   : > { %v512_v15 = vpop.xlane.xlu1 %511 }
 0x2ae   : > { %v515_v17 = vadd.f32 %v512_v15, %v503_v14  ;;  %v509_v18 = vpop.xlane.xlu0 %508 }
 0x2af   : > { %v514_v19 = vadd.f32 %v509_v18, %v502_v16 }
 0x2b0   : > { %519 = vst.msk [vmem:[#allocation3 + $0x10] sm:$0xff] %vm294_vm1, %v515_v17 }
 0x2b1   : > { %518 = vst.msk [vmem:[#allocation3 + $0x8] sm:$0xff] %vm294_vm1, %v514_v19  ;;  %v526_v26 = vpop.permute.xlu1 %525 }
 0x2b2   : > { %v538_v33 = vmul.f32 %v526_v26, %v520_v29 }
 0x2b3   : > { %v628_v20 = vld [vmem:[#allocation3] sm:$0xff] }
 0x2b4   : > { %899 = vrcp.f32 %v628_v20 }
 0x2b5   : > { %v531_v32 = vpop.permute.xlu1 %530 }
 0x2b6   : > { %v536_v28 = vpop.permute.xlu0 %535  ;;  %v539_v37 = vmul.f32 %v531_v32, %v521_v31 }
 0x2b7   : > { %v630_v22 = vld [vmem:[#allocation3 + $0x10] sm:$0xff]  ;;  %v540_v30 = vmul.f32 %v536_v28, %v522_v27 }
 0x2b8   : > { %v629_v21 = vld [vmem:[#allocation3 + $0x8] sm:$0xff] }
 0x2b9   : > { %901 = vrcp.f32 %v629_v21 }
 0x2ba   : > { %903 = vrcp.f32 %v630_v22 }
 0x2be   : > { %v900_v23 = vpop.eup %899 }
 0x2bf   : > { %636 = vperm.xlu1 %879, %v900_v23  }
 0x2c3   : > { %v902_v24 = vpop.eup %901 }
 0x2c4   : > { %641 = vperm.xlu1 %879, %v902_v24   ;;  %v904_v25 = vpop.eup %903 }
 0x2c8   : > { %646 = vperm.xlu1 %879, %v904_v25  }
 0x2f6   : > { %v846_v34 = vpop.f32.mrb[0].mxu1 }
 0x2f7   : > { %v615_v35 = vadd.f32 %v846_v34, %v540_v30  ;;  %v599_v36 = vpop.f32.mrb[1].mxu1 }
 0x2f8   : > { %v613_v38 = vadd.f32 %v599_v36, %v538_v33  ;;  %v847_v39 = vpop.f32.mrb[2].mxu1 }
 0x2f9   : > { %618 = vst.msk [vmem:[#allocation4 + $0x10] sm:$0xff] %vm301_vm0, %v615_v35  ;;  %v602_v40 = vpop.f32.mrb[3].mxu1 }
 0x2fa   : > { %616 = vst.msk [vmem:[#allocation4] sm:$0xff] %vm301_vm0, %v613_v38  ;;  %v614_v41 = vadd.f32 %v602_v40, %v539_v37 }
 0x2fc   : > { %617 = vst.msk [vmem:[#allocation4 + $0x8] sm:$0xff] %vm301_vm0, %v614_v41 }
 0x300   : > { %v627_v50 = vld [vmem:[#allocation4 + $0x10] sm:$0xff] }
 0x301   : > { %v625_v42 = vld [vmem:[#allocation4] sm:$0xff] }
 0x303   : > { %v626_v46 = vld [vmem:[#allocation4 + $0x8] sm:$0xff] }
 0x33e   : > { %v637_v43 = vpop.permute.xlu1 %636 }
 0x33f   : > { %v649_v44 = vmul.f32 %v637_v43, %v625_v42 }
 0x341   : > { %v821_v45 = vpack.c.bf16 %v649_v44, %v649_v44 }
 0x343   : > { %666 = vst.msk [vmem:[%s287_s28] sm:$0xf] %vm665_vm13, %v821_v45  ;;  %v642_v47 = vpop.permute.xlu1 %641 }
 0x344   : > { %v650_v48 = vmul.f32 %v642_v47, %v626_v46 }
 0x346   : > { %v822_v49 = vpack.c.bf16 %v650_v48, %v650_v48 }
 0x347   : > { %v647_v51 = vpop.permute.xlu1 %646 }
 0x348   : > { %667 = vst.msk [vmem:[%s287_s28 + $0x4] sm:$0xf] %vm665_vm13, %v822_v49  ;;  %v651_v52 = vmul.f32 %v647_v51, %v627_v50 }
 0x34a   : > { %v823_v53 = vpack.c.bf16 %v651_v52, %v651_v52 }
 0x34c   : > { %668 = vst.msk [vmem:[%s287_s28 + $0x8] sm:$0xf] %vm665_vm13, %v823_v53 }
 0x34d PF: > { %s13_s14 = sadd.s32 1, %s927_s14   ;;  %s1033_s12 = smov %s923_s13 }
 0x34e   : > { %p10_p5 = scmp.ge.s32.totalorder %s13_s14, 10   ;;  %s1034_s13 = smov %s1036_s15 }
 0x350   :  { %12 = sbr.rel (!%p10_p5) target bundleno = 2 (0x2), region = 76 }

</bundles_post_ra>
